<compile_context>
chip_gen: v7x
topology: tpu7x:2x2x1
jax: 0.10.0
libtpu: 0.0.40
codegen_flags: <defaults>
</compile_context>

<pallas_src>
import functools

import jax
import jax.numpy as jnp
from jax import lax
from jax.experimental import pallas as pl
from jax.experimental.pallas import tpu as pltpu

LANE = 128   # vreg lane width  -> packed feature axis
SUB = 8      # vreg sublane     -> row axis

# packed-weight stack (5 tiles of 128x128, bf16) / bias stack rows (f32, padded to 8)
W_DH, W_DO, W_A0, W_B0, W_L1 = range(5)
B_DH, B_DO, B_L0, B_L1 = range(4)
N_W, N_B = 5, 8


def _round_up(n, m):
    return ((n + m - 1) // m) * m


# ----------------------------------------------------------------------------
# Fused Pallas kernel: netDec -> 2 lane-packed map layers -> class-mean prototypes -> -euclid
# ----------------------------------------------------------------------------

def _proto_fused_kernel(x_ref, mean_ref, w_ref, b_ref, out_ref):
    f32, bf16 = jnp.float32, jnp.bfloat16

    def mm(a, k):                      # bf16 x bf16 operands, f32 accumulation on the MXU
        return jnp.dot(a.astype(bf16), w_ref[k], preferred_element_type=f32)

    def bias(k):
        return b_ref[k:k + 1, :]       # (1, 128) sublane-broadcast add, kept in f32

    x = x_ref[...]                     # (R, 128) f32: support rows, then query rows, then pad

    # --- embed support + query in ONE pass; every split output is lane-packed -------------
    # netDec: feat2 = ReLU(x@Wdh+b) pre-shifted into lanes [DEC_O:E); feat1 lands in [0:DEC_O)
    h = jnp.maximum(mm(x, W_DH) + bias(B_DH), 0.0)
    ext0 = mm(h, W_DO) + bias(B_DO) + h              # packed cat(feat1, feat2) in lanes [0:E)
    # map layer 0: main | extra packed in lanes [0:F) | [F:F+E)
    a1 = jnp.maximum(mm(x, W_A0) + mm(ext0, W_B0) + bias(B_L0), 0.0)
    # map layer 1: main | extra packed in lanes [0:O) | [O:O+E)  == cat(main, extra) embedding
    emb = jnp.maximum(mm(a1, W_L1) + bias(B_L1), 0.0)

    # --- prototypes: per-class mean of the support rows via one averaging matmul ----------
    proto = jnp.dot(mean_ref[...], emb, preferred_element_type=f32)      # (128, 128)

    # --- -euclidean(query, proto):  d^2 = |q|^2 + |p|^2 - 2 q.p
    #     |p|^2 folded into a spare (all-zero) lane of the cross matmul; |q|^2 an XLU reduce.
    lane = lax.broadcasted_iota(jnp.int32, (1, LANE), 1)
    spare = (lane == LANE - 1).astype(f32)                               # lane 127 is unused
    psq = jnp.sum(proto * proto, axis=-1, keepdims=True)                 # (128, 1)
    qsq = jnp.sum(emb * emb, axis=-1, keepdims=True)                     # (R, 1)
    p_aug = proto - 0.5 * psq * spare
    q_aug = emb + spare
    nt = (((1,), (1,)), ((), ()))                                        # q @ p^T, no transpose
    cross = lax.dot_general(q_aug, p_aug, nt, preferred_element_type=f32)   # (R, 128)
    d2 = jnp.maximum(qsq - 2.0 * cross, 0.0)         # clamp fp cancellation before sqrt
    out_ref[...] = -jnp.sqrt(d2)


# ----------------------------------------------------------------------------
# Wrappers
# ----------------------------------------------------------------------------

@functools.partial(jax.jit, static_argnames=("way", "shot", "nq"))
def _forward_episodes(sup, qry, w_stack, b_stack, *, way, shot, nq):
    ep, _, in_f = sup.shape
    ns, nqr = way * shot, way * nq
    tot = ns + nqr
    tot_pad = _round_up(tot, SUB)                    # only sublane padding, never to 128

    x = jnp.concatenate([sup, qry], axis=1).astype(jnp.float32)          # (EP, tot, F)
    x = jnp.pad(x, ((0, 0), (0, tot_pad - tot), (0, LANE - in_f)))       # (EP, tot_pad, 128)

    # per-class averaging matrix: prototypes = mean_mat @ embedded (query columns stay zero)
    rows = jnp.repeat(jnp.arange(way), shot)
    cols = jnp.arange(ns)
    mean_mat = jnp.zeros((LANE, tot_pad), jnp.float32).at[rows, cols].set(1.0 / shot)

    out = pl.pallas_call(
        _proto_fused_kernel,
        out_shape=jax.ShapeDtypeStruct((ep, tot_pad, LANE), jnp.float32),
        grid=(ep,),
        in_specs=[
            pl.BlockSpec((None, tot_pad, LANE), lambda e: (e, 0, 0)),    # per-episode rows
            pl.BlockSpec((LANE, tot_pad), lambda e: (0, 0)),             # pinned across grid
            pl.BlockSpec((N_W, LANE, LANE), lambda e: (0, 0, 0)),        # weights, pinned
            pl.BlockSpec((N_B, LANE), lambda e: (0, 0)),                 # biases, pinned
        ],
        out_specs=pl.BlockSpec((None, tot_pad, LANE), lambda e: (e, 0, 0)),
        compiler_params=pltpu.CompilerParams(
            dimension_semantics=("parallel",)),      # v7x: shard episodes across both TCs
    )(x, mean_mat, w_stack, b_stack)

    return out[:, ns:ns + nqr, :way]                 # (EP, way*nq, way)


def prototypical_forward_episodes(support, query, params):
    """support: (EP, way, shot, F); query: (EP, way, nq, F) -> logits (EP, way*nq, way)."""
    ep, way, shot, in_f = support.shape
    nq = query.shape[2]
    assert in_f <= LANE
    sup = support.reshape(ep, way * shot, in_f)
    qry = query.reshape(ep, way * nq, in_f)
    return _forward_episodes(sup, qry, params["w_stack"], params["b_stack"],
                             way=way, shot=shot, nq=nq)


def prototypical_forward(support, query, params):
    """Original list interface: lists (length=way) of (n, F) arrays; returns list of logits."""
    way, nq = len(support), query[0].shape[0]
    sup = jnp.stack(support)[None]                   # (1, way, shot, F)
    qry = jnp.stack(query)[None]
    logits = prototypical_forward_episodes(sup, qry, params)[0]
    return [logits[c * nq:(c + 1) * nq] for c in range(way)]


# ----------------------------------------------------------------------------
# Parameter construction (torch.nn.Linear-style uniform init) + lane-packed bf16 packing
# ----------------------------------------------------------------------------

def _torch_linear_init(key, out_f, in_f):
    k1, k2 = jax.random.split(key)
    bound = 1.0 / float(in_f) ** 0.5
    w = jax.random.uniform(k1, (out_f, in_f), jnp.float32, -bound, bound)  # torch (out, in)
    b = jax.random.uniform(k2, (out_f,), jnp.float32, -bound, bound)
    return w, b


def _place(dst, w_t, r0, c0):
    return dst.at[r0:r0 + w_t.shape[0], c0:c0 + w_t.shape[1]].set(w_t)


def build_params(key, in_features, out_features, extra_dim, dec_hidden, dec_out):
    assert extra_dim == dec_hidden + dec_out
    F, O, E = in_features, out_features, extra_dim
    assert F <= LANE and F + E <= LANE and O + E <= LANE
    keys = jax.random.split(key, 8)
    wm0, bm0 = _torch_linear_init(keys[0], F, F)         # mapper Linear(F, F)
    wm1, bm1 = _torch_linear_init(keys[1], O, F)         # mapper Linear(F, O)
    wf0, bf0 = _torch_linear_init(keys[2], F + E, E)     # from_extra layer 0
    wf1, bf1 = _torch_linear_init(keys[3], O + E, E)     # from_extra layer 1
    wt0, bt0 = _torch_linear_init(keys[4], E, F)         # to_extra layer 0
    wt1, bt1 = _torch_linear_init(keys[5], E, F)         # to_extra layer 1
    wdh, bdh = _torch_linear_init(keys[6], dec_hidden, F)   # synthetic netDec hidden
    wdo, bdo = _torch_linear_init(keys[7], dec_out, dec_hidden)

    raw = dict(wm0=wm0, bm0=bm0, wm1=wm1, bm1=bm1, wf0=wf0, bf0=bf0, wf1=wf1, bf1=bf1,
               wt0=wt0, bt0=bt0, wt1=wt1, bt1=bt1, wdh=wdh, bdh=bdh, wdo=wdo, bdo=bdo)

    Z = jnp.zeros((LANE, LANE), jnp.float32)
    # netDec: x(lanes 0:F) -> feat2 at lanes [dec_out:E); feat2 -> feat1 at lanes [0:dec_out)
    w_dh = _place(Z, wdh.T, 0, dec_out)
    w_do = _place(Z, wdo.T, dec_out, 0)
    # layer 0: x -> [main | to_extra] in lanes [0:F) | [F:F+E)
    w_a0 = _place(_place(Z, wm0.T, 0, 0), wt0.T, 0, F)
    # layer 0: ext0 (= cat(feat1,feat2), lanes [0:E)) -> [from_main | from_extra] same packing
    w_b0 = _place(_place(Z, wf0[E:, :].T, 0, 0), wf0[:E, :].T, 0, F)
    # layer 1: a1 (main lanes [0:F), extra lanes [F:F+E)) -> [main | extra] in [0:O) | [O:O+E)
    w_l1 = _place(_place(_place(_place(Z, wm1.T, 0, 0), wt1.T, 0, O),
                         wf1[E:, :].T, F, 0), wf1[:E, :].T, F, O)
    w_stack = jnp.stack([w_dh, w_do, w_a0, w_b0, w_l1]).astype(jnp.bfloat16)

    zb = jnp.zeros((LANE,), jnp.float32)
    b_dh = zb.at[dec_out:dec_out + dec_hidden].set(bdh)
    b_do = zb.at[0:dec_out].set(bdo)
    b_l0 = zb.at[0:F].set(bm0 + bf0[E:]).at[F:F + E].set(bt0 + bf0[:E])
    b_l1 = zb.at[0:O].set(bm1 + bf1[E:]).at[O:O + E].set(bt1 + bf1[:E])
    b_stack = jnp.stack([b_dh, b_do, b_l0, b_l1] + [zb] * (N_B - 4))

    return {"w_stack": w_stack,          # (5, 128, 128) bf16
            "b_stack": b_stack,          # (8, 128) f32
            "raw": raw}


# ----------------------------------------------------------------------------
# Pure-JAX reference (mirrors the original per-class torch forward, f32 weights)
# ----------------------------------------------------------------------------

def _reference_forward(support, query, raw):
    hi = lax.Precision.HIGHEST

    def linear(x, w, b):
        return jnp.dot(x, w.T, precision=hi) + b

    def net_dec(x):
        hidden = jnp.maximum(linear(x, raw["wdh"], raw["bdh"]), 0.0)   # feat2
        return linear(hidden, raw["wdo"], raw["bdo"]), hidden          # feat1, feat2

    def map_fn(main, feat1, feat2):
        extra = jnp.concatenate([feat1, feat2], axis=1)
        for wm, bm, wf, bf, wt, bt in [
            (raw["wm0"], raw["bm0"], raw["wf0"], raw["bf0"], raw["wt0"], raw["bt0"]),
            (raw["wm1"], raw["bm1"], raw["wf1"], raw["bf1"], raw["wt1"], raw["bt1"]),
        ]:
            from_extra = linear(extra, wf, bf)
            to_extra = linear(main, wt, bt)
            main_z = linear(main, wm, bm)
            e_out = to_extra.shape[1]
            extra = jnp.maximum(to_extra + from_extra[:, :e_out], 0.0)
            main = jnp.maximum(main_z + from_extra[:, e_out:], 0.0)
        return jnp.concatenate([main, extra], axis=1)

    prototypes = []
    for cf in support:
        f1, f2 = net_dec(cf)
        prototypes.append(map_fn(cf, f1, f2).mean(axis=0))
    prototypes = jnp.stack(prototypes)

    logits = []
    for cf in query:
        f1, f2 = net_dec(cf)
        z = map_fn(cf, f1, f2)
        d = jnp.sqrt(jnp.sum((z[:, None, :] - prototypes[None, :, :]) ** 2, axis=-1))
        logits.append(-d)
    return logits


# ----------------------------------------------------------------------------

if __name__ == "__main__":
    key = jax.random.PRNGKey(0)
    k_sup, k_qry, k_par = jax.random.split(key, 3)

    episodes, way, shot, n_queries = 4, 3, 4, 5
    in_features, out_features = 32, 16
    dec_hidden, dec_out = 20, 12
    extra_dim = dec_hidden + dec_out   # = 32, dim of cat(feat1, feat2)

    support_arr = jax.random.normal(k_sup, (episodes, way, shot, in_features), jnp.float32)
    query_arr = jax.random.normal(k_qry, (episodes, way, n_queries, in_features), jnp.float32)

    params = build_params(k_par, in_features, out_features, extra_dim, dec_hidden, dec_out)

    logits = prototypical_forward_episodes(support_arr, query_arr, params)
    jax.block_until_ready(logits)

    assert logits.shape == (episodes, way * n_queries, way)
    assert bool(jnp.all(jnp.isfinite(logits)))
    assert bool(jnp.all(logits <= 0.0))   # logits are negative euclidean distances

    refs = []
    for e in range(episodes):
        sup_e = [support_arr[e, c] for c in range(way)]
        qry_e = [query_arr[e, c] for c in range(way)]
        refs.append(jnp.stack(_reference_forward(sup_e, qry_e, params["raw"])))
    ref = jnp.stack(refs)                                      # (EP, way, nq, way)
    out = logits.reshape(episodes, way, n_queries, way)
    assert bool(jnp.allclose(out, ref, rtol=5e-2, atol=5e-2)), (
        f"max abs err {float(jnp.max(jnp.abs(out - ref)))}")

    # single-episode list API (mirrors the original forward(support, query, netDec) signature)
    per_class = prototypical_forward([support_arr[0, c] for c in range(way)],
                                     [query_arr[0, c] for c in range(way)], params)
    assert bool(jnp.allclose(jnp.stack(per_class), ref[0], rtol=5e-2, atol=5e-2))

    print("KERNEL_OK")
</pallas_src>

<mosaic_0001>
module attributes {stable_mosaic.version = 11 : i64} {
  func.func @_proto_fused_kernel(%arg0: i32, %arg1: memref<1x32x128xf32, #tpu.memory_space<vmem>>, %arg2: memref<128x32xf32, #tpu.memory_space<vmem>>, %arg3: memref<5x128x128xbf16, #tpu.memory_space<vmem>>, %arg4: memref<8x128xf32, #tpu.memory_space<vmem>>, %arg5: memref<1x32x128xf32, #tpu.memory_space<vmem>>) attributes {dimension_semantics = [#tpu.dimension_semantics<parallel>], iteration_bounds = array<i64: 4>, scalar_prefetch = 0 : i64, scratch_operands = 0 : i64, tpu.core_type = #tpu.core_type<tc>, window_params = [{transform_indices = @transform_0, window_bounds = array<i64: 1, 32, 128>}, {pipeline_mode = #tpu.pipeline_mode<synchronous>, transform_indices = @transform_1, window_bounds = array<i64: 128, 32>}, {pipeline_mode = #tpu.pipeline_mode<synchronous>, transform_indices = @transform_2, window_bounds = array<i64: 5, 128, 128>}, {pipeline_mode = #tpu.pipeline_mode<synchronous>, transform_indices = @transform_3, window_bounds = array<i64: 8, 128>}, {transform_indices = @transform_4, window_bounds = array<i64: 1, 32, 128>}]} {
    %c0 = arith.constant 0 : index
    %c0_0 = arith.constant 0 : index
    %c0_1 = arith.constant 0 : index
    %0 = vector.load %arg1[%c0, %c0_0, %c0_1] : memref<1x32x128xf32, #tpu.memory_space<vmem>>, vector<1x32x128xf32>
    %1 = vector.shape_cast %0 : vector<1x32x128xf32> to vector<32x128xf32>
    %2 = arith.truncf %1 : vector<32x128xf32> to vector<32x128xbf16>
    %c0_2 = arith.constant 0 : index
    %c0_3 = arith.constant 0 : index
    %c0_4 = arith.constant 0 : index
    %3 = vector.load %arg3[%c0_2, %c0_3, %c0_4] : memref<5x128x128xbf16, #tpu.memory_space<vmem>>, vector<1x128x128xbf16>
    %4 = vector.shape_cast %3 : vector<1x128x128xbf16> to vector<128x128xbf16>
    %cst = arith.constant dense<0.000000e+00> : vector<32x128xf32>
    %5 = tpu.matmul %2, %4, %cst {dimension_numbers = #tpu.dot_dimension_numbers<[1], [0], [0], [1], [0, 0, 1, 1], [], []>} : vector<32x128xbf16>, vector<128x128xbf16>, vector<32x128xf32> -> vector<32x128xf32>
    %c0_5 = arith.constant 0 : index
    %c0_6 = arith.constant 0 : index
    %6 = vector.load %arg4[%c0_5, %c0_6] : memref<8x128xf32, #tpu.memory_space<vmem>>, vector<1x128xf32>
    %7 = vector.broadcast %6 : vector<1x128xf32> to vector<32x128xf32>
    %8 = arith.addf %5, %7 : vector<32x128xf32>
    %cst_7 = arith.constant 0.000000e+00 : f32
    %9 = vector.broadcast %cst_7 : f32 to vector<32x128xf32>
    %10 = arith.maximumf %8, %9 : vector<32x128xf32>
    %11 = arith.truncf %10 : vector<32x128xf32> to vector<32x128xbf16>
    %c1 = arith.constant 1 : index
    %c0_8 = arith.constant 0 : index
    %c0_9 = arith.constant 0 : index
    %12 = vector.load %arg3[%c1, %c0_8, %c0_9] : memref<5x128x128xbf16, #tpu.memory_space<vmem>>, vector<1x128x128xbf16>
    %13 = vector.shape_cast %12 : vector<1x128x128xbf16> to vector<128x128xbf16>
    %cst_10 = arith.constant dense<0.000000e+00> : vector<32x128xf32>
    %14 = tpu.matmul %11, %13, %cst_10 {dimension_numbers = #tpu.dot_dimension_numbers<[1], [0], [0], [1], [0, 0, 1, 1], [], []>} : vector<32x128xbf16>, vector<128x128xbf16>, vector<32x128xf32> -> vector<32x128xf32>
    %c1_11 = arith.constant 1 : index
    %c0_12 = arith.constant 0 : index
    %15 = vector.load %arg4[%c1_11, %c0_12] : memref<8x128xf32, #tpu.memory_space<vmem>>, vector<1x128xf32>
    %16 = vector.broadcast %15 : vector<1x128xf32> to vector<32x128xf32>
    %17 = arith.addf %14, %16 : vector<32x128xf32>
    %18 = arith.addf %17, %10 : vector<32x128xf32>
    %19 = arith.truncf %1 : vector<32x128xf32> to vector<32x128xbf16>
    %c2 = arith.constant 2 : index
    %c0_13 = arith.constant 0 : index
    %c0_14 = arith.constant 0 : index
    %20 = vector.load %arg3[%c2, %c0_13, %c0_14] : memref<5x128x128xbf16, #tpu.memory_space<vmem>>, vector<1x128x128xbf16>
    %21 = vector.shape_cast %20 : vector<1x128x128xbf16> to vector<128x128xbf16>
    %cst_15 = arith.constant dense<0.000000e+00> : vector<32x128xf32>
    %22 = tpu.matmul %19, %21, %cst_15 {dimension_numbers = #tpu.dot_dimension_numbers<[1], [0], [0], [1], [0, 0, 1, 1], [], []>} : vector<32x128xbf16>, vector<128x128xbf16>, vector<32x128xf32> -> vector<32x128xf32>
    %23 = arith.truncf %18 : vector<32x128xf32> to vector<32x128xbf16>
    %c3 = arith.constant 3 : index
    %c0_16 = arith.constant 0 : index
    %c0_17 = arith.constant 0 : index
    %24 = vector.load %arg3[%c3, %c0_16, %c0_17] : memref<5x128x128xbf16, #tpu.memory_space<vmem>>, vector<1x128x128xbf16>
    %25 = vector.shape_cast %24 : vector<1x128x128xbf16> to vector<128x128xbf16>
    %cst_18 = arith.constant dense<0.000000e+00> : vector<32x128xf32>
    %26 = tpu.matmul %23, %25, %cst_18 {dimension_numbers = #tpu.dot_dimension_numbers<[1], [0], [0], [1], [0, 0, 1, 1], [], []>} : vector<32x128xbf16>, vector<128x128xbf16>, vector<32x128xf32> -> vector<32x128xf32>
    %27 = arith.addf %22, %26 : vector<32x128xf32>
    %c2_19 = arith.constant 2 : index
    %c0_20 = arith.constant 0 : index
    %28 = vector.load %arg4[%c2_19, %c0_20] : memref<8x128xf32, #tpu.memory_space<vmem>>, vector<1x128xf32>
    %29 = vector.broadcast %28 : vector<1x128xf32> to vector<32x128xf32>
    %30 = arith.addf %27, %29 : vector<32x128xf32>
    %cst_21 = arith.constant 0.000000e+00 : f32
    %31 = vector.broadcast %cst_21 : f32 to vector<32x128xf32>
    %32 = arith.maximumf %30, %31 : vector<32x128xf32>
    %33 = arith.truncf %32 : vector<32x128xf32> to vector<32x128xbf16>
    %c4 = arith.constant 4 : index
    %c0_22 = arith.constant 0 : index
    %c0_23 = arith.constant 0 : index
    %34 = vector.load %arg3[%c4, %c0_22, %c0_23] : memref<5x128x128xbf16, #tpu.memory_space<vmem>>, vector<1x128x128xbf16>
    %35 = vector.shape_cast %34 : vector<1x128x128xbf16> to vector<128x128xbf16>
    %cst_24 = arith.constant dense<0.000000e+00> : vector<32x128xf32>
    %36 = tpu.matmul %33, %35, %cst_24 {dimension_numbers = #tpu.dot_dimension_numbers<[1], [0], [0], [1], [0, 0, 1, 1], [], []>} : vector<32x128xbf16>, vector<128x128xbf16>, vector<32x128xf32> -> vector<32x128xf32>
    %c3_25 = arith.constant 3 : index
    %c0_26 = arith.constant 0 : index
    %37 = vector.load %arg4[%c3_25, %c0_26] : memref<8x128xf32, #tpu.memory_space<vmem>>, vector<1x128xf32>
    %38 = vector.broadcast %37 : vector<1x128xf32> to vector<32x128xf32>
    %39 = arith.addf %36, %38 : vector<32x128xf32>
    %cst_27 = arith.constant 0.000000e+00 : f32
    %40 = vector.broadcast %cst_27 : f32 to vector<32x128xf32>
    %41 = arith.maximumf %39, %40 : vector<32x128xf32>
    %c0_28 = arith.constant 0 : index
    %c0_29 = arith.constant 0 : index
    %42 = vector.load %arg2[%c0_28, %c0_29] : memref<128x32xf32, #tpu.memory_space<vmem>>, vector<128x32xf32>
    %cst_30 = arith.constant dense<0.000000e+00> : vector<128x128xf32>
    %43 = tpu.matmul %42, %41, %cst_30 {dimension_numbers = #tpu.dot_dimension_numbers<[1], [0], [0], [1], [0, 0, 1, 1], [], []>} : vector<128x32xf32>, vector<32x128xf32>, vector<128x128xf32> -> vector<128x128xf32>
    %44 = tpu.iota {dimensions = array<i32: 1>} : vector<1x128xi32>
    %c127_i32 = arith.constant 127 : i32
    %45 = vector.broadcast %c127_i32 : i32 to vector<1x128xi32>
    %46 = arith.cmpi eq, %44, %45 : vector<1x128xi32>
    %47 = arith.extui %46 : vector<1x128xi1> to vector<1x128xi32>
    %48 = arith.sitofp %47 : vector<1x128xi32> to vector<1x128xf32>
    %49 = arith.mulf %43, %43 : vector<128x128xf32>
    %cst_31 = arith.constant dense<0.000000e+00> : vector<128xf32>
    %50 = vector.multi_reduction <add>, %49, %cst_31 [1] : vector<128x128xf32> to vector<128xf32>
    %51 = vector.shape_cast %50 : vector<128xf32> to vector<128x1xf32>
    %52 = arith.mulf %41, %41 : vector<32x128xf32>
    %cst_32 = arith.constant dense<0.000000e+00> : vector<32xf32>
    %53 = vector.multi_reduction <add>, %52, %cst_32 [1] : vector<32x128xf32> to vector<32xf32>
    %54 = vector.shape_cast %53 : vector<32xf32> to vector<32x1xf32>
    %cst_33 = arith.constant 5.000000e-01 : f32
    %55 = vector.broadcast %cst_33 : f32 to vector<128x1xf32>
    %56 = arith.mulf %55, %51 : vector<128x1xf32>
    %57 = vector.broadcast %56 : vector<128x1xf32> to vector<128x128xf32>
    %58 = vector.broadcast %48 : vector<1x128xf32> to vector<128x128xf32>
    %59 = arith.mulf %57, %58 : vector<128x128xf32>
    %60 = arith.subf %43, %59 : vector<128x128xf32>
    %61 = vector.broadcast %48 : vector<1x128xf32> to vector<32x128xf32>
    %62 = arith.addf %41, %61 : vector<32x128xf32>
    %cst_34 = arith.constant dense<0.000000e+00> : vector<32x128xf32>
    %63 = tpu.matmul %62, %60, %cst_34 {dimension_numbers = #tpu.dot_dimension_numbers<[1], [1], [0], [0], [0, 0, 1, 0], [], []>} : vector<32x128xf32>, vector<128x128xf32>, vector<32x128xf32> -> vector<32x128xf32>
    %cst_35 = arith.constant 2.000000e+00 : f32
    %64 = vector.broadcast %cst_35 : f32 to vector<32x128xf32>
    %65 = arith.mulf %64, %63 : vector<32x128xf32>
    %66 = vector.broadcast %54 : vector<32x1xf32> to vector<32x128xf32>
    %67 = arith.subf %66, %65 : vector<32x128xf32>
    %cst_36 = arith.constant 0.000000e+00 : f32
    %68 = vector.broadcast %cst_36 : f32 to vector<32x128xf32>
    %69 = arith.maximumf %67, %68 : vector<32x128xf32>
    %70 = math.sqrt %69 : vector<32x128xf32>
    %cst_37 = arith.constant 0.000000e+00 : f32
    %71 = vector.broadcast %cst_37 : f32 to vector<32x128xf32>
    %72 = arith.subf %71, %70 : vector<32x128xf32>
    %c0_38 = arith.constant 0 : index
    %c0_39 = arith.constant 0 : index
    %c0_40 = arith.constant 0 : index
    %73 = vector.load %arg5[%c0_38, %c0_39, %c0_40] : memref<1x32x128xf32, #tpu.memory_space<vmem>>, vector<1x32x128xf32>
    %74 = vector.shape_cast %73 : vector<1x32x128xf32> to vector<32x128xf32>
    %75 = vector.shape_cast %72 : vector<32x128xf32> to vector<1x32x128xf32>
    tpu.vector_store %arg5[%c0_38, %c0_39, %c0_40], %75 {strides = array<i32>} : memref<1x32x128xf32, #tpu.memory_space<vmem>>, vector<1x32x128xf32>,
    return
  }
  func.func @transform_0(%arg0: i32) -> (i32, i32, i32) {
    %c0_i32 = arith.constant 0 : i32
    %c0_i32_0 = arith.constant 0 : i32
    %c0_i32_1 = arith.constant 0 : i32
    return %arg0, %c0_i32, %c0_i32_0 : i32, i32, i32
  }
  func.func @transform_1(%arg0: i32) -> (i32, i32) {
    %c0_i32 = arith.constant 0 : i32
    %c0_i32_0 = arith.constant 0 : i32
    %c0_i32_1 = arith.constant 0 : i32
    return %c0_i32, %c0_i32_0 : i32, i32
  }
  func.func @transform_2(%arg0: i32) -> (i32, i32, i32) {
    %c0_i32 = arith.constant 0 : i32
    %c0_i32_0 = arith.constant 0 : i32
    %c0_i32_1 = arith.constant 0 : i32
    %c0_i32_2 = arith.constant 0 : i32
    return %c0_i32, %c0_i32_0, %c0_i32_1 : i32, i32, i32
  }
  func.func @transform_3(%arg0: i32) -> (i32, i32) {
    %c0_i32 = arith.constant 0 : i32
    %c0_i32_0 = arith.constant 0 : i32
    %c0_i32_1 = arith.constant 0 : i32
    return %c0_i32, %c0_i32_0 : i32, i32
  }
  func.func @transform_4(%arg0: i32) -> (i32, i32, i32) {
    %c0_i32 = arith.constant 0 : i32
    %c0_i32_0 = arith.constant 0 : i32
    %c0_i32_1 = arith.constant 0 : i32
    return %arg0, %c0_i32, %c0_i32_0 : i32, i32, i32
  }
}

</mosaic_0001>

<bundles_post_ra>
// kernel: _forward_episodes.1
= control target key start
LH: loop header
LB: loop body
LE: loop exit
PB: predicated region body
PF: predicated region fallthrough
CT: control target
= control target key end

     0   :  { %s1868_s15 = smov 0   ;;  %s2234_s0 = inlined_call_operand.vmem [shape: f32[4,32,128], index: 0, kind: input, shape index: {}]   ;;  %s2235_s1 = inlined_call_operand.vmem [shape: f32[128,32], index: 1, kind: input, shape index: {}]   ;;  %s2236_s2 = inlined_call_operand.vmem [shape: bf16[5,128,128], index: 2, kind: input, shape index: {}]   ;;  %s2237_s3 = inlined_call_operand.vmem [shape: f32[8,128], index: 3, kind: input, shape index: {}]   ;;  %s2238_s4 = inlined_call_operand.vmem [shape: f32[4,32,128], index: 4, kind: output, shape index: {}]  }
   0x1 LB: > { %s1335_s16 = sadd.s32 4294967295, %s1840_s15   ;;  %p1339_p0 = scmp.ge.s32.totalorder %s1840_s15, 1  ;;  %s1840_s15 = sphi %s1868_s15, %s14_s15  }
   0x2   : > { %p162_p1 = scmp.lt.s32.totalorder %s1840_s15, 5 }
   0x4   : > { %p163_p2 = pnand %p1339_p0, %p162_p1 }
   0x5   : > { %v1786_v0 = vld [vmem:[%s2236_s2] sm:$0xff] (!%p163_p2)   ;;  %p188_p3 = scmp.lt.s32.totalorder (!%p163_p2), %s1335_s16, 3  ;;  %v1787_v1 = vld [vmem:[%s2236_s2 + $0x8] sm:$0xff] (!%p163_p2)   ;;  %v1788_v2 = vld [vmem:[%s2236_s2 + $0x10] sm:$0xff] (!%p163_p2)   ;;  %vm836_vm0 = vcmask (!%p163_p2), 261120  }
   0x6   : > { %166 = sbr.rel (%p163_p2) target bundleno = 1639 (0x667), region = 36  ;;  %1563 = vmatprep.subr.bf16.mxu0 (!%p163_p2), %v1786_v0  ;;  %v1789_v3 = vld [vmem:[%s2236_s2 + $0x18] sm:$0xff] (!%p163_p2)   ;;  %v1790_v7 = vld [vmem:[%s2236_s2 + $0x20] sm:$0xff] (!%p163_p2)   ;;  %v1791_v8 = vld [vmem:[%s2236_s2 + $0x28] sm:$0xff] (!%p163_p2)  }
   0x7   : > { %1564 = vmatpush3.bf16.msra.mxu0 (!%p163_p2), %v1786_v0  ;;  %v1792_v9 = vld [vmem:[%s2236_s2 + $0x30] sm:$0xff] (!%p163_p2)   ;;  %v1793_v10 = vld [vmem:[%s2236_s2 + $0x38] sm:$0xff] (!%p163_p2)   ;;  %v1794_v13 = vld [vmem:[%s2236_s2 + $0x40] sm:$0xff] (!%p163_p2)  }
   0x8   : > { %1565 = vmatprep.subr.bf16.mxu0 (!%p163_p2), %v1787_v1  ;;  %v1795_v15 = vld [vmem:[%s2236_s2 + $0x48] sm:$0xff] (!%p163_p2)   ;;  %v1796_v16 = vld [vmem:[%s2236_s2 + $0x50] sm:$0xff] (!%p163_p2)   ;;  %v1797_v17 = vld [vmem:[%s2236_s2 + $0x58] sm:$0xff] (!%p163_p2)  }
   0x9   : > { %v1798_v18 = vld [vmem:[%s2236_s2 + $0x60] sm:$0xff] (!%p163_p2)   ;;  %v1799_v19 = vld [vmem:[%s2236_s2 + $0x68] sm:$0xff] (!%p163_p2)   ;;  %v1800_v20 = vld [vmem:[%s2236_s2 + $0x70] sm:$0xff] (!%p163_p2)  }
   0xa   : > { %v1801_v21 = vld [vmem:[%s2236_s2 + $0x78] sm:$0xff] (!%p163_p2)   ;;  %v1802_v22 = vld [vmem:[%s2236_s2 + $0xc0] sm:$0xff] (!%p163_p2)   ;;  %v1803_v38 = vld [vmem:[%s2236_s2 + $0xc8] sm:$0xff] (!%p163_p2)  }
   0xb   : > { %1566 = vmatpush3.bf16.msra.mxu0 (!%p163_p2), %v1787_v1  ;;  %v1344_v23 = vld [vmem:[%s2237_s3] ss:$0 sm:$0xff] (!%p163_p2)  ;;  %v1804_v39 = vld [vmem:[%s2236_s2 + $0xd0] sm:$0xff] (!%p163_p2)   ;;  %v1805_v40 = vld [vmem:[%s2236_s2 + $0xd8] sm:$0xff] (!%p163_p2)  }
   0xc   : > { %1567 = vmatprep.subr.bf16.mxu0 (!%p163_p2), %v1788_v2  ;;  %v1806_v41 = vld [vmem:[%s2236_s2 + $0xe0] sm:$0xff] (!%p163_p2)   ;;  %v1807_v42 = vld [vmem:[%s2236_s2 + $0xe8] sm:$0xff] (!%p163_p2)   ;;  %v1808_v43 = vld [vmem:[%s2236_s2 + $0xf0] sm:$0xff] (!%p163_p2)  }
   0xd   : > { %s2240_s16 = smov (!%p188_p3, %s1335_s16), 3  ;;  %v1809_v44 = vld [vmem:[%s2236_s2 + $0xf8] sm:$0xff]   ;;  %v1810_v45 = vld [vmem:[%s2236_s2 + $0x80] sm:$0xff]   ;;  %v1819_v47 = vld [vmem:[%s2236_s2 + $0x108] sm:$0xff]  }
   0xe   : > { %s1471_s23 = sshll.u32 %s2240_s16, 5  ;;  %v1818_v46 = vld [vmem:[%s2236_s2 + $0x100] sm:$0xff]   ;;  %v1820_v48 = vld [vmem:[%s2236_s2 + $0x110] sm:$0xff]   ;;  %v1821_v49 = vld [vmem:[%s2236_s2 + $0x118] sm:$0xff]  }
   0xf   : > { %s192_s26 = scalar_lea.vmem %s2234_s0, %s1471_s23  ;;  %1568 = vmatpush3.bf16.msra.mxu0 %v1788_v2  ;;  %1643 = vmatprep.subr.bf16.mxu1 %v1818_v46  ;;  %v1822_v50 = vld [vmem:[%s2236_s2 + $0x120] sm:$0xff]   ;;  %v1823_v51 = vld [vmem:[%s2236_s2 + $0x128] sm:$0xff]   ;;  %s197_s28 = scalar_lea.vmem %s2238_s4, %s1471_s23 }
  0x10   : > { %v199_v4 = vld [vmem:[%s192_s26] sm:$0xff]  ;;  %v200_v5 = vld [vmem:[%s192_s26 + $0x8] sm:$0xff]  ;;  %1569 = vmatprep.subr.bf16.mxu0 %v1789_v3  ;;  %v201_v11 = vld [vmem:[%s192_s26 + $0x10] sm:$0xff]  ;;  %1644 = vmatpush3.bf16.msra.mxu1 %v1818_v46 }
  0x11   : > { %v1896_v6 = vpack.c.bf16 %v200_v5, %v199_v4  ;;  %v202_v12 = vld [vmem:[%s192_s26 + $0x18] sm:$0xff]  ;;  %1645 = vmatprep.subr.bf16.mxu1 %v1819_v47  ;;  %v1369_v52 = vld [vmem:[%s2237_s3 + $0x1] ss:$0 sm:$0xff]  ;;  %v1812_v4 = vld [vmem:[%s2236_s2 + $0x90] sm:$0xff]  }
  0x12   : > { %v1914_v14 = vpack.c.bf16 %v202_v12, %v201_v11  ;;  %v1813_v5 = vld [vmem:[%s2236_s2 + $0x98] sm:$0xff]   ;;  %v1426_v12 = vld [vmem:[%s2237_s3 + $0x2] ss:$0 sm:$0xff] }
  0x13   : > { %1579 = vmatprep.mubr.bf16.mxu0 %v1896_v6  ;;  %1570 = vmatpush3.bf16.msra.mxu0 %v1789_v3  ;;  %v1811_v3 = vld [vmem:[%s2236_s2 + $0x88] sm:$0xff]   ;;  %v1825_v11 = vld [vmem:[%s2236_s2 + $0x138] sm:$0xff]   ;;  %v824_v46 = vld [vmem:[%s2235_s1 + $0x20] sm:$0xff] }
  0x14   : > { %1571 = vmatprep.subr.bf16.mxu0 %v1790_v7  ;;  %1646 = vmatpush3.bf16.msra.mxu1 %v1819_v47  ;;  %v825_v47 = vld [vmem:[%s2235_s1 + $0x28] sm:$0xff] }
  0x15   : > { %1647 = vmatprep.subr.bf16.mxu1 %v1820_v48 }
  0x17   : > { %1572 = vmatpush3.bf16.msra.mxu0 %v1790_v7  ;;  %v1814_v7 = vld [vmem:[%s2236_s2 + $0xa0] sm:$0xff]  }
  0x18   : > { %1573 = vmatprep.subr.bf16.mxu0 %v1791_v8  ;;  %1648 = vmatpush3.bf16.msra.mxu1 %v1820_v48  ;;  %v826_v48 = vld [vmem:[%s2235_s1 + $0x30] sm:$0xff] }
  0x19   : > { %1649 = vmatprep.subr.bf16.mxu1 %v1821_v49 }
  0x1b   : > { %1574 = vmatpush3.bf16.msra.mxu0 %v1791_v8  ;;  %v1816_v8 = vld [vmem:[%s2236_s2 + $0xb0] sm:$0xff]  }
  0x1c   : > { %1575 = vmatprep.subr.bf16.mxu0 %v1792_v9  ;;  %1650 = vmatpush3.bf16.msra.mxu1 %v1821_v49  ;;  %v827_v49 = vld [vmem:[%s2235_s1 + $0x38] sm:$0xff] }
  0x1d   : > { %1651 = vmatprep.subr.bf16.mxu1 %v1822_v50 }
  0x1f   : > { %1576 = vmatpush3.bf16.msra.mxu0 %v1792_v9  ;;  %v1817_v9 = vld [vmem:[%s2236_s2 + $0xb8] sm:$0xff]  }
  0x20   : > { %1577 = vmatprep.subr.bf16.mxu0 %v1793_v10  ;;  %1652 = vmatpush3.bf16.msra.mxu1 %v1822_v50  ;;  %v828_v50 = vld [vmem:[%s2235_s1 + $0x40] sm:$0xff] }
  0x21   : > { %1653 = vmatprep.subr.bf16.mxu1 %v1823_v51 }
  0x23   : > { %1578 = vmatpush3.bf16.msra.mxu0 %v1793_v10  ;;  %v1824_v10 = vld [vmem:[%s2236_s2 + $0x130] sm:$0xff]  }
  0x24   : > { %1583 = vmatprep.subr.bf16.mxu0 %v1794_v13  ;;  %1654 = vmatpush3.bf16.msra.mxu1 %v1823_v51  ;;  %v1030_v51 = vlaneseq }
  0x25   : > { %1655 = vmatprep.subr.bf16.mxu1 %v1824_v10 }
  0x26   : > { %1580 = vmatmul.mubr.bf16.vlgmr.msra.gmra.mrb[0].mxu0 %v1914_v14 }
  0x27   : > { %1584 = vmatpush3.bf16.msra.mxu0 %v1794_v13 }
  0x28   : > { %1585 = vmatprep.subr.bf16.mxu0 %v1795_v15  ;;  %1656 = vmatpush3.bf16.msra.mxu1 %v1824_v10 }
  0x29   : > { %1657 = vmatprep.subr.bf16.mxu1 %v1825_v11 }
  0x2b   : > { %1586 = vmatpush3.bf16.msra.mxu0 %v1795_v15 }
  0x2c   : > { %1587 = vmatprep.subr.bf16.mxu0 %v1796_v16  ;;  %1658 = vmatpush3.bf16.msra.mxu1 %v1825_v11 }
  0x2f   : > { %1588 = vmatpush3.bf16.msra.mxu0 %v1796_v16 }
  0x30   : > { %1589 = vmatprep.subr.bf16.mxu0 %v1797_v17 }
  0x33   : > { %1590 = vmatpush3.bf16.msra.mxu0 %v1797_v17 }
  0x34   : > { %1591 = vmatprep.subr.bf16.mxu0 %v1798_v18 }
  0x37   : > { %1592 = vmatpush3.bf16.msra.mxu0 %v1798_v18 }
  0x38   : > { %1593 = vmatprep.subr.bf16.mxu0 %v1799_v19 }
  0x3b   : > { %1594 = vmatpush3.bf16.msra.mxu0 %v1799_v19 }
  0x3c   : > { %1595 = vmatprep.subr.bf16.mxu0 %v1800_v20 }
  0x3f   : > { %1596 = vmatpush3.bf16.msra.mxu0 %v1800_v20 }
  0x40   : > { %1597 = vmatprep.subr.bf16.mxu0 %v1801_v21 }
  0x43   : > { %1598 = vmatpush3.bf16.msra.mxu0 %v1801_v21 }
  0x44   : > { %1603 = vmatprep.subr.bf16.mxu0 %v1802_v22 }
  0xf9   : > { %v1581_v24 = vpop.f32.mrb[0].mxu0 }
  0xfa   : > { %v308_v25 = vpop.f32.mrb[1].mxu0  ;;  %v1946_v28 = vadd.f32 %v1581_v24, %v1344_v23 }
  0xfb   : > { %v1944_v26 = vadd.f32 %v1344_v23, %v308_v25  ;;  %v1582_v27 = vpop.f32.mrb[2].mxu0 }
  0xfc   : > { %v1948_v29 = vadd.f32 %v1582_v27, %v1344_v23  ;;  %v311_v30 = vpop.f32.mrb[3].mxu0  ;;  %v325_v35 = vmax.f32 %v1946_v28, 0.0  ;;  %v820_v27 = vld [vmem:[%s2235_s1] sm:$0xff] }
  0xfd   : > { %v1950_v31 = vadd.f32 %v1344_v23, %v311_v30  ;;  %v323_v33 = vmax.f32 %v1944_v26, 0.0  ;;  %v1443_v28 = vld [vmem:[%s2237_s3 + $0x3] ss:$0 sm:$0xff] }
  0xfe   : > { %v326_v32 = vmax.f32 %v1948_v29, 0.0 }
  0xff   : > { %v324_v34 = vmax.f32 %v1950_v31, 0.0 }
 0x100   : > { %v328_v37 = vpack.c.bf16 %v326_v32, %v325_v35 }
 0x101   : > { %v327_v36 = vpack.c.bf16 %v324_v34, %v323_v33 }
 0x103   : > { %1599 = vmatprep.mubr.bf16.mxu0 %v327_v36 }
 0x104   : > { %1600 = vmatmul.mubr.bf16.vlgmr.msra.gmra.mrb[4].mxu0 %v328_v37 }
 0x105   : > { %1604 = vmatpush3.bf16.msra.mxu0 %v1802_v22 }
 0x106   : > { %1605 = vmatprep.subr.bf16.mxu0 %v1803_v38 }
 0x109   : > { %1606 = vmatpush3.bf16.msra.mxu0 %v1803_v38 }
 0x10a   : > { %1607 = vmatprep.subr.bf16.mxu0 %v1804_v39 }
 0x10d   : > { %1608 = vmatpush3.bf16.msra.mxu0 %v1804_v39 }
 0x10e   : > { %1609 = vmatprep.subr.bf16.mxu0 %v1805_v40 }
 0x111   : > { %1610 = vmatpush3.bf16.msra.mxu0 %v1805_v40 }
 0x112   : > { %1611 = vmatprep.subr.bf16.mxu0 %v1806_v41 }
 0x115   : > { %1612 = vmatpush3.bf16.msra.mxu0 %v1806_v41 }
 0x116   : > { %1613 = vmatprep.subr.bf16.mxu0 %v1807_v42 }
 0x119   : > { %1614 = vmatpush3.bf16.msra.mxu0 %v1807_v42 }
 0x11a   : > { %1615 = vmatprep.subr.bf16.mxu0 %v1808_v43 }
 0x11d   : > { %1616 = vmatpush3.bf16.msra.mxu0 %v1808_v43  ;;  %v821_v43 = vld [vmem:[%s2235_s1 + $0x8] sm:$0xff] }
 0x11e   : > { %1617 = vmatprep.subr.bf16.mxu0 %v1809_v44 }
 0x121   : > { %1618 = vmatpush3.bf16.msra.mxu0 %v1809_v44  ;;  %v822_v44 = vld [vmem:[%s2235_s1 + $0x10] sm:$0xff] }
 0x122   : > { %1623 = vmatprep.subr.bf16.mxu0 %v1810_v45 }
 0x1d7   : > { %v1601_v53 = vpop.f32.mrb[4].mxu0 }
 0x1d8   : > { %v442_v54 = vadd.f32 %v1601_v53, %v1369_v52  ;;  %v433_v55 = vpop.f32.mrb[5].mxu0  ;;  %v830_v53 = vld [vmem:[%s2235_s1 + $0x50] sm:$0xff] }
 0x1d9   : > { %v434_v56 = vadd.f32 %v1369_v52, %v433_v55  ;;  %v1602_v57 = vpop.f32.mrb[6].mxu0  ;;  %v831_v55 = vld [vmem:[%s2235_s1 + $0x58] sm:$0xff] }
 0x1da   : > { %v445_v58 = vadd.f32 %v1602_v57, %v1369_v52  ;;  %v436_v59 = vpop.f32.mrb[7].mxu0  ;;  %v450_v61 = vadd.f32 %v442_v54, %v325_v35  ;;  %v1031_v54 = vand.u32 127, %v1030_v51  ;;  %v833_v57 = vld [vmem:[%s2235_s1 + $0x68] sm:$0xff] }
 0x1db   : > { %v437_v60 = vadd.f32 %v1369_v52, %v436_v59  ;;  %v448_v63 = vadd.f32 %v434_v56, %v323_v33  ;;  %v829_v52 = vld [vmem:[%s2235_s1 + $0x48] sm:$0xff]  ;;  %v832_v56 = vld [vmem:[%s2235_s1 + $0x60] sm:$0xff]  ;;  %v1842_v59 = vmov 0.0  }
 0x1dc   : > { %v451_v62 = vadd.f32 %v445_v58, %v326_v32  ;;  %vm1032_vm1 = vcmp.eq.s32.totalorder %v1031_v54, 127  ;;  %v834_v58 = vld [vmem:[%s2235_s1 + $0x70] sm:$0xff] }
 0x1dd   : > { %v449_v0 = vadd.f32 %v437_v60, %v324_v34  ;;  %v2106_v60 = vsel %vm1032_vm1, 1.0, %v1842_v59 }
 0x1de   : > { %v470_v1 = vpack.c.bf16 %v451_v62, %v450_v61  ;;  %v835_v61 = vld [vmem:[%s2235_s1 + $0x78] sm:$0xff] }
 0x1df   : > { %v469_v2 = vpack.c.bf16 %v449_v0, %v448_v63 }
 0x1e1   : > { %1619 = vmatprep.mubr.bf16.mxu0 %v469_v2 }
 0x1e2   : > { %1620 = vmatmul.mubr.bf16.vlgmr.msra.gmra.mrb[8].mxu0 %v470_v1 }
 0x1e3   : > { %1624 = vmatpush3.bf16.msra.mxu0 %v1810_v45  ;;  %1639 = vmatprep.mubr.bf16.mxu0 %v1896_v6  ;;  %v1815_v6 = vld [vmem:[%s2236_s2 + $0xa8] sm:$0xff]   ;;  %v823_v45 = vld [vmem:[%s2235_s1 + $0x18] sm:$0xff] }
 0x1e4   : > { %1625 = vmatprep.subr.bf16.mxu0 %v1811_v3 }
 0x1e7   : > { %1626 = vmatpush3.bf16.msra.mxu0 %v1811_v3 }
 0x1e8   : > { %1627 = vmatprep.subr.bf16.mxu0 %v1812_v4 }
 0x1eb   : > { %1628 = vmatpush3.bf16.msra.mxu0 %v1812_v4 }
 0x1ec   : > { %1629 = vmatprep.subr.bf16.mxu0 %v1813_v5 }
 0x1ef   : > { %1630 = vmatpush3.bf16.msra.mxu0 %v1813_v5 }
 0x1f0   : > { %1631 = vmatprep.subr.bf16.mxu0 %v1814_v7 }
 0x1f3   : > { %1632 = vmatpush3.bf16.msra.mxu0 %v1814_v7 }
 0x1f4   : > { %1633 = vmatprep.subr.bf16.mxu0 %v1815_v6 }
 0x1f7   : > { %1634 = vmatpush3.bf16.msra.mxu0 %v1815_v6 }
 0x1f8   : > { %1635 = vmatprep.subr.bf16.mxu0 %v1816_v8 }
 0x1fb   : > { %1636 = vmatpush3.bf16.msra.mxu0 %v1816_v8 }
 0x1fc   : > { %1637 = vmatprep.subr.bf16.mxu0 %v1817_v9 }
 0x1ff   : > { %1638 = vmatpush3.bf16.msra.mxu0 %v1817_v9 }
 0x202   : > { %1640 = vmatmul.mubr.bf16.vlgmr.msra.gmra.mrb[8].mxu0 %v1914_v14 }
 0x2d5   : > { %v1641_v13 = vpop.f32.mrb[8].mxu0 }
 0x2d6   : > { %v689_v15 = vadd.f32 %v1641_v13, %v1426_v12  ;;  %v667_v16 = vpop.f32.mrb[9].mxu0 }
 0x2d7   : > { %v687_v14 = vadd.f32 %v1426_v12, %v667_v16  ;;  %v1642_v17 = vpop.f32.mrb[10].mxu0 }
 0x2d8   : > { %v690_v18 = vadd.f32 %v1642_v17, %v1426_v12  ;;  %v670_v19 = vpop.f32.mrb[11].mxu0  ;;  %v693_v21 = vmax.f32 %v689_v15, 0.0 }
 0x2d9   : > { %v688_v20 = vadd.f32 %v1426_v12, %v670_v19  ;;  %v691_v23 = vmax.f32 %v687_v14, 0.0 }
 0x2da   : > { %v694_v22 = vmax.f32 %v690_v18, 0.0 }
 0x2db   : > { %v692_v24 = vmax.f32 %v688_v20, 0.0 }
 0x2dc   : > { %v696_v25 = vpack.c.bf16 %v694_v22, %v693_v21 }
 0x2dd   : > { %v695_v26 = vpack.c.bf16 %v692_v24, %v691_v23 }
 0x2df   : > { %1659 = vmatprep.mubr.bf16.mxu1 %v695_v26 }
 0x2e0   : > { %1660 = vmatmul.mubr.bf16.vlgmr.msra.gmra.mrb[0].mxu1 %v696_v25 }
 0x2e1   : > { %1671 = vmatprep.mubr.msk.f32.mxu1 %vm836_vm0, %v820_v27 }
 0x3b3   : > { %v1661_v29 = vpop.f32.mrb[0].mxu1 }
 0x3b4   : > { %v810_v30 = vadd.f32 %v1661_v29, %v1443_v28  ;;  %v801_v31 = vpop.f32.mrb[1].mxu1 }
 0x3b5   : > { %v802_v32 = vadd.f32 %v1443_v28, %v801_v31  ;;  %v1662_v33 = vpop.f32.mrb[2].mxu1 }
 0x3b6   : > { %v813_v34 = vadd.f32 %v1662_v33, %v1443_v28  ;;  %v804_v35 = vpop.f32.mrb[3].mxu1  ;;  %v2040_v37 = vmax.f32 %v810_v30, 0.0 }
 0x3b7   : > { %v805_v36 = vadd.f32 %v1443_v28, %v804_v35  ;;  %v2044_v39 = vmax.f32 %v802_v32, 0.0 }
 0x3b8   : > { %v2042_v38 = vmax.f32 %v813_v34, 0.0  ;;  %v1085_v33 = vmul.f32 %v2040_v37, %v2040_v37 }
 0x3b9   : > { %v2046_v40 = vmax.f32 %v805_v36, 0.0  ;;  %v1143_v62 = vadd.f32 %v2106_v60, %v2044_v39  ;;  %v1083_v31 = vmul.f32 %v2044_v39, %v2044_v39 }
 0x3ba   : > { %v1737_v41 = vpack.c.bf16 %v2042_v38, %v2040_v37  ;;  %v1086_v34 = vmul.f32 %v2042_v38, %v2042_v38 }
 0x3bb   : > { %v1733_v42 = vpack.c.bf16 %v2046_v40, %v2044_v39  ;;  %v1084_v32 = vmul.f32 %v2046_v40, %v2046_v40 }
 0x3bd   : > { %1734 = vmatprep.subr.bf16.mxu1 %v1733_v42 }
 0x3be   : > { %1736 = vmatpush3.bf16.msra.mxu1 %v1733_v42 }
 0x3bf   : > { %1738 = vmatprep.subr.bf16.mxu1 %v1737_v41 }
 0x3c2   : > { %1740 = vmatpush3.bf16.msra.mxu1 %v1737_v41 }
 0x3c5   : > { %1672 = vmatmul.mubr.msk.f32.vlgmr.msra.gmra.mrb[4].mxu1 %vm836_vm0, %v821_v43 }
 0x3c6   : > { %1674 = vmatprep.mubr.msk.f32.mxu1 %vm836_vm0, %v822_v44 }
 0x3c9   : > { %1675 = vmatmul.mubr.msk.f32.gmra.mrb[6].mxu1 %vm836_vm0, %v823_v45 }
 0x3ca   : > { %1677 = vmatprep.mubr.msk.f32.mxu1 %vm836_vm0, %v824_v46 }
 0x3cd   : > { %1678 = vmatmul.mubr.msk.f32.gmra.mrb[8].mxu1 %vm836_vm0, %v825_v47 }
 0x3ce   : > { %1680 = vmatprep.mubr.msk.f32.mxu1 %vm836_vm0, %v826_v48 }
 0x3d1   : > { %1681 = vmatmul.mubr.msk.f32.gmra.mrb[10].mxu1 %vm836_vm0, %v827_v49 }
 0x3d2   : > { %1683 = vmatprep.mubr.msk.f32.mxu1 %vm836_vm0, %v828_v50 }
 0x3d5   : > { %1684 = vmatmul.mubr.msk.f32.gmra.mrb[12].mxu1 %vm836_vm0, %v829_v52 }
 0x3d6   : > { %1686 = vmatprep.mubr.msk.f32.mxu1 %vm836_vm0, %v830_v53 }
 0x3d9   : > { %1687 = vmatmul.mubr.msk.f32.gmra.mrb[14].mxu1 %vm836_vm0, %v831_v55 }
 0x3da   : > { %1689 = vmatprep.mubr.msk.f32.mxu1 %vm836_vm0, %v832_v56 }
 0x3dd   : > { %1690 = vmatmul.mubr.msk.f32.gmra.mrb[16].mxu1 %vm836_vm0, %v833_v57 }
 0x3de   : > { %1692 = vmatprep.mubr.msk.f32.mxu1 %vm836_vm0, %v834_v58 }
 0x3e1   : > { %1693 = vmatmul.mubr.msk.f32.gmra.mrb[18].mxu1 %vm836_vm0, %v835_v61 }
 0x3e2   : > { %1727 = vmatprep.mubr.f32.mxu1 %v1143_v62 }
 0x498   : > { %v2116_v63 = vpop.f32.mrb[4].mxu1 }
 0x499   : > { %v2118_v0 = vpop.f32.mrb[5].mxu1  ;;  %v1036_v4 = vmul.f32 %v2116_v63, %v2116_v63 }
 0x49a   : > { %v1035_v1 = vmul.f32 %v2118_v0, %v2118_v0 }
 0x49c   : > { %1051 = vadd.xlane.f32.xlu0 %v1035_v1  ;;  %v2122_v2 = vpop.f32.mrb[6].mxu1 }
 0x49d   : > { %v2124_v3 = vpop.f32.mrb[7].mxu1  ;;  %v1038_v6 = vmul.f32 %v2122_v2, %v2122_v2 }
 0x49e   : > { %v1037_v5 = vmul.f32 %v2124_v3, %v2124_v3 }
 0x4a0   : > { %1053 = vadd.xlane.f32.xlu0 %v1036_v4  ;;  %1055 = vadd.xlane.f32.xlu1 %v1037_v5  ;;  %v2130_v7 = vpop.f32.mrb[8].mxu1 }
 0x4a1   : > { %v2134_v8 = vpop.f32.mrb[9].mxu1  ;;  %v1040_v11 = vmul.f32 %v2130_v7, %v2130_v7 }
 0x4a2   : > { %v1039_v9 = vmul.f32 %v2134_v8, %v2134_v8 }
 0x4a4   : > { %1057 = vadd.xlane.f32.xlu1 %v1038_v6  ;;  %1059 = vadd.xlane.f32.xlu0 %v1039_v9  ;;  %v2138_v10 = vpop.f32.mrb[10].mxu1 }
 0x4a5   : > { %v2142_v12 = vpop.f32.mrb[11].mxu1  ;;  %v1042_v16 = vmul.f32 %v2138_v10, %v2138_v10 }
 0x4a6   : > { %v1041_v13 = vmul.f32 %v2142_v12, %v2142_v12 }
 0x4a8   : > { %1061 = vadd.xlane.f32.xlu1 %v1040_v11  ;;  %1063 = vadd.xlane.f32.xlu0 %v1041_v13  ;;  %v2146_v15 = vpop.f32.mrb[12].mxu1 }
 0x4a9   : > { %v2150_v14 = vpop.f32.mrb[13].mxu1  ;;  %v1044_v19 = vmul.f32 %v2146_v15, %v2146_v15 }
 0x4aa   : > { %v1043_v17 = vmul.f32 %v2150_v14, %v2150_v14 }
 0x4ac   : > { %1065 = vadd.xlane.f32.xlu1 %v1042_v16  ;;  %1067 = vadd.xlane.f32.xlu0 %v1043_v17  ;;  %v2154_v18 = vpop.f32.mrb[14].mxu1 }
 0x4ad   : > { %v2158_v20 = vpop.f32.mrb[15].mxu1  ;;  %v1046_v23 = vmul.f32 %v2154_v18, %v2154_v18 }
 0x4ae   : > { %v1045_v21 = vmul.f32 %v2158_v20, %v2158_v20 }
 0x4b0   : > { %1069 = vadd.xlane.f32.xlu1 %v1044_v19  ;;  %1071 = vadd.xlane.f32.xlu0 %v1045_v21  ;;  %v2162_v22 = vpop.f32.mrb[16].mxu1 }
 0x4b1   : > { %v2166_v24 = vpop.f32.mrb[17].mxu1  ;;  %v1048_v27 = vmul.f32 %v2162_v22, %v2162_v22 }
 0x4b2   : > { %v1047_v25 = vmul.f32 %v2166_v24, %v2166_v24 }
 0x4b4   : > { %1073 = vadd.xlane.f32.xlu1 %v1046_v23  ;;  %1075 = vadd.xlane.f32.xlu0 %v1047_v25  ;;  %v2170_v26 = vpop.f32.mrb[18].mxu1 }
 0x4b5   : > { %v2174_v28 = vpop.f32.mrb[19].mxu1  ;;  %v1050_v30 = vmul.f32 %v2170_v26, %v2170_v26 }
 0x4b6   : > { %v1049_v29 = vmul.f32 %v2174_v28, %v2174_v28 }
 0x4b8   : > { %1077 = vadd.xlane.f32.xlu1 %v1048_v27  ;;  %1079 = vadd.xlane.f32.xlu0 %v1049_v29 }
 0x4bc   : > { %1081 = vadd.xlane.f32.xlu1 %v1050_v30  ;;  %1087 = vadd.xlane.f32.xlu0 %v1083_v31 }
 0x4c0   : > { %1089 = vadd.xlane.f32.xlu1 %v1084_v32  ;;  %1091 = vadd.xlane.f32.xlu0 %v1085_v33 }
 0x4c4   : > { %1093 = vadd.xlane.f32.xlu1 %v1086_v34 }
 0x529   : > { %v1052_v35 = vpop.xlane.xlu0 %1051 }
 0x52a   : > { %v1095_v36 = vmul.f32 0.5, %v1052_v35 }
 0x52c   : > { %v1111_v39 = vmul.f32 %v2106_v60, %v1095_v36 }
 0x52d   : > { %v1054_v41 = vpop.xlane.xlu0 %1053  ;;  %v1056_v42 = vpop.xlane.xlu1 %1055 }
 0x52e   : > { %v1096_v43 = vmul.f32 0.5, %v1054_v41  ;;  %v1097_v44 = vmul.f32 0.5, %v1056_v42  ;;  %v1127_v49 = vsub.f32 %v2118_v0, %v1111_v39 }
 0x530   : > { %v1112_v45 = vmul.f32 %v2106_v60, %v1096_v43  ;;  %v1113_v46 = vmul.f32 %v2106_v60, %v1097_v44 }
 0x531   : > { %v1058_v47 = vpop.xlane.xlu1 %1057  ;;  %v1060_v48 = vpop.xlane.xlu0 %1059 }
 0x532   : > { %v1128_v50 = vsub.f32 %v2116_v63, %v1112_v45  ;;  %v1098_v51 = vmul.f32 0.5, %v1058_v47  ;;  %v1099_v52 = vmul.f32 0.5, %v1060_v48  ;;  %v1129_v55 = vsub.f32 %v2124_v3, %v1113_v46 }
 0x534   : > { %v1114_v53 = vmul.f32 %v2106_v60, %v1098_v51  ;;  %v1741_v54 = vpack.c.bf16 %v1128_v50, %v1127_v49  ;;  %v1115_v59 = vmul.f32 %v2106_v60, %v1099_v52 }
 0x535   : > { %v1062_v56 = vpop.xlane.xlu1 %1061  ;;  %v1064_v57 = vpop.xlane.xlu0 %1063 }
 0x536   : > { %v1130_v58 = vsub.f32 %v2122_v2, %v1114_v53  ;;  %v1100_v61 = vmul.f32 0.5, %v1062_v56  ;;  %v1101_v62 = vmul.f32 0.5, %v1064_v57  ;;  %1742 = vmatprep.subr.bf16.mxu1 %v1741_v54  ;;  %v1131_v6 = vsub.f32 %v2134_v8, %v1115_v59 }
 0x537   : > { %1744 = vmatpush3.bf16.xpose.msra.mxu1 %v1741_v54 }
 0x538   : > { %v1116_v0 = vmul.f32 %v2106_v60, %v1100_v61  ;;  %v1745_v63 = vpack.c.bf16 %v1130_v58, %v1129_v55  ;;  %v1117_v1 = vmul.f32 %v2106_v60, %v1101_v62 }
 0x539   : > { %v1066_v4 = vpop.xlane.xlu1 %1065  ;;  %v1068_v5 = vpop.xlane.xlu0 %1067 }
 0x53a   : > { %v1132_v3 = vsub.f32 %v2130_v7, %v1116_v0  ;;  %v1102_v9 = vmul.f32 0.5, %v1066_v4  ;;  %v1103_v11 = vmul.f32 0.5, %v1068_v5  ;;  %1746 = vmatprep.subr.bf16.mxu1 %v1745_v63  ;;  %v1133_v16 = vsub.f32 %v2142_v12, %v1117_v1 }
 0x53c   : > { %v1118_v2 = vmul.f32 %v2106_v60, %v1102_v9  ;;  %v1749_v13 = vpack.c.bf16 %v1132_v3, %v1131_v6  ;;  %v1119_v23 = vmul.f32 %v2106_v60, %v1103_v11 }
 0x53d   : > { %v1070_v17 = vpop.xlane.xlu1 %1069  ;;  %v1072_v19 = vpop.xlane.xlu0 %1071 }
 0x53e   : > { %v1134_v21 = vsub.f32 %v2138_v10, %v1118_v2  ;;  %v1104_v25 = vmul.f32 0.5, %v1070_v17  ;;  %v1105_v27 = vmul.f32 0.5, %v1072_v19  ;;  %v1135_v32 = vsub.f32 %v2150_v14, %v1119_v23 }
 0x53f   : > { %1748 = vmatpush3.bf16.xpose.msra.mxu1 %v1745_v63 }
 0x540   : > { %v1120_v8 = vmul.f32 %v2106_v60, %v1104_v25  ;;  %1750 = vmatprep.subr.bf16.mxu1 %v1749_v13  ;;  %v1753_v7 = vpack.c.bf16 %v1134_v21, %v1133_v16  ;;  %v1121_v29 = vmul.f32 %v2106_v60, %v1105_v27 }
 0x541   : > { %v1074_v30 = vpop.xlane.xlu1 %1073  ;;  %v1076_v31 = vpop.xlane.xlu0 %1075 }
 0x542   : > { %v1136_v12 = vsub.f32 %v2146_v15, %v1120_v8  ;;  %v1106_v33 = vmul.f32 0.5, %v1074_v30  ;;  %v1107_v34 = vmul.f32 0.5, %v1076_v31  ;;  %v1137_v36 = vsub.f32 %v2158_v20, %v1121_v29 }
 0x544   : > { %v1122_v10 = vmul.f32 %v2106_v60, %v1106_v33  ;;  %v1757_v35 = vpack.c.bf16 %v1136_v12, %v1135_v32  ;;  %v1123_v43 = vmul.f32 %v2106_v60, %v1107_v34 }
 0x545   : > { %v1078_v41 = vpop.xlane.xlu1 %1077  ;;  %v1080_v42 = vpop.xlane.xlu0 %1079 }
 0x546   : > { %v1138_v39 = vsub.f32 %v2154_v18, %v1122_v10  ;;  %v1108_v44 = vmul.f32 0.5, %v1078_v41  ;;  %v1109_v45 = vmul.f32 0.5, %v1080_v42  ;;  %v1139_v47 = vsub.f32 %v2166_v24, %v1123_v43 }
 0x547   : > { %1752 = vmatpush3.bf16.xpose.msra.mxu1 %v1749_v13  ;;  %v1145_v24 = vadd.f32 %v2106_v60, %v2040_v37 }
 0x548   : > { %v1124_v14 = vmul.f32 %v2106_v60, %v1108_v44  ;;  %1754 = vmatprep.subr.bf16.mxu1 %v1753_v7  ;;  %v1761_v15 = vpack.c.bf16 %v1138_v39, %v1137_v36  ;;  %v1125_v20 = vmul.f32 %v2106_v60, %v1109_v45 }
 0x549   : > { %v1082_v46 = vpop.xlane.xlu1 %1081  ;;  %v1088_v56 = vpop.xlane.xlu0 %1087 }
 0x54a   : > { %v1140_v48 = vsub.f32 %v2162_v22, %v1124_v14  ;;  %v1110_v49 = vmul.f32 0.5, %v1082_v46  ;;  %v1141_v51 = vsub.f32 %v2174_v28, %v1125_v20  ;;  %v1144_v22 = vadd.f32 %v2106_v60, %v2046_v40 }
 0x54c   : > { %v1126_v50 = vmul.f32 %v2106_v60, %v1110_v49  ;;  %v1765_v18 = vpack.c.bf16 %v1140_v48, %v1139_v47 }
 0x54d   : > { %v1090_v57 = vpop.xlane.xlu1 %1089  ;;  %v1092_v4 = vpop.xlane.xlu0 %1091 }
 0x54e   : > { %v1142_v52 = vsub.f32 %v2170_v26, %v1126_v50  ;;  %v1146_v26 = vadd.f32 %v2106_v60, %v2042_v38 }
 0x54f   : > { %1756 = vmatpush3.bf16.xpose.msra.mxu1 %v1753_v7 }
 0x550   : > { %1758 = vmatprep.subr.bf16.mxu1 %v1757_v35  ;;  %v1769_v53 = vpack.c.bf16 %v1142_v52, %v1141_v51 }
 0x551   : > { %v1094_v5 = vpop.xlane.xlu1 %1093 }
 0x557   : > { %1760 = vmatpush3.bf16.xpose.msra.mxu1 %v1757_v35 }
 0x558   : > { %1762 = vmatprep.subr.bf16.mxu1 %v1761_v15 }
 0x55f   : > { %1764 = vmatpush3.bf16.xpose.msra.mxu1 %v1761_v15 }
 0x560   : > { %1766 = vmatprep.subr.bf16.mxu1 %v1765_v18 }
 0x567   : > { %1768 = vmatpush3.bf16.xpose.msra.mxu1 %v1765_v18 }
 0x568   : > { %1770 = vmatprep.subr.bf16.mxu1 %v1769_v53 }
 0x56f   : > { %1772 = vmatpush3.bf16.xpose.msra.mxu1 %v1769_v53 }
 0x576   : > { %1728 = vmatmul.mubr.f32.vlgmr.msra.gmra.mrb[20].mxu1 %v1144_v22 }
 0x577   : > { %1730 = vmatprep.mubr.f32.mxu1 %v1145_v24 }
 0x57a   : > { %1731 = vmatmul.mubr.f32.gmra.mrb[22].mxu1 %v1146_v26 }
 0x649   : > { %v1729_v28 = vpop.f32.mrb[20].mxu1 }
 0x64a   : > { %v1233_v54 = vmul.f32 2.0, %v1729_v28  ;;  %v1213_v55 = vpop.f32.mrb[21].mxu1 }
 0x64b   : > { %v1232_v58 = vmul.f32 2.0, %v1213_v55 }
 0x64c   : > { %v1237_v59 = vsub.f32 %v1090_v57, %v1233_v54 }
 0x64d   : > { %v1236_v61 = vsub.f32 %v1088_v56, %v1232_v58  ;;  %v1732_v62 = vpop.f32.mrb[22].mxu1 }
 0x64e   : > { %v1241_v0 = vmax.f32 %v1237_v59, 0.0  ;;  %v1235_v40 = vmul.f32 2.0, %v1732_v62  ;;  %v1223_v63 = vpop.f32.mrb[23].mxu1 }
 0x64f   : > { %v1240_v1 = vmax.f32 %v1236_v61, 0.0  ;;  %v1234_v37 = vmul.f32 2.0, %v1223_v63 }
 0x650   : > { %1826 = vrsqrt.f32 %v1241_v0  ;;  %v1239_v38 = vsub.f32 %v1094_v5, %v1235_v40  ;;  %vm1253_vm2 = vcmp.eq.f32.partialorder %v1241_v0, inf  ;;  %v1256_v13 = vand.u32 2147483648, %v1241_v0 }
 0x651   : > { %1828 = vrsqrt.f32 %v1240_v1  ;;  %v1238_v60 = vsub.f32 %v1092_v4, %v1234_v37  ;;  %vm1255_vm3 = vcmp.eq.f32.partialorder %v1241_v0, 0.0  ;;  %vm1246_vm4 = vcmp.eq.f32.partialorder %v1240_v1, inf }
 0x652   : > { %v1243_v6 = vmax.f32 %v1239_v38, 0.0  ;;  %v1249_v19 = vand.u32 2147483648, %v1240_v1  ;;  %vm1248_vm5 = vcmp.eq.f32.partialorder %v1240_v1, 0.0 }
 0x653   : > { %v1242_v3 = vmax.f32 %v1238_v60, 0.0 }
 0x654   : > { %1830 = vrsqrt.f32 %v1243_v6  ;;  %vm1267_vm6 = vcmp.eq.f32.partialorder %v1243_v6, inf  ;;  %v1270_v31 = vand.u32 2147483648, %v1243_v6  ;;  %vm1269_vm7 = vcmp.eq.f32.partialorder %v1243_v6, 0.0 }
 0x655   : > { %1832 = vrsqrt.f32 %v1242_v3  ;;  %vm1260_vm8 = vcmp.eq.f32.partialorder %v1242_v3, inf  ;;  %v1263_v33 = vand.u32 2147483648, %v1242_v3  ;;  %vm1262_vm9 = vcmp.eq.f32.partialorder %v1242_v3, 0.0 }
 0x65a   : > { %v1827_v9 = vpop.eup %1826 }
 0x65b   : > { %v1829_v11 = vpop.eup %1828  ;;  %v1252_v2 = vmul.f32 %v1827_v9, %v1241_v0 }
 0x65c   : > { %v1245_v16 = vmul.f32 %v1829_v11, %v1240_v1 }
 0x65d   : > { %v1254_v17 = vsel %vm1253_vm2, %v1241_v0, %v1252_v2 }
 0x65e   : > { %v1257_v21 = vsel %vm1255_vm3, %v1256_v13, %v1254_v17  ;;  %v1247_v23 = vsel %vm1246_vm4, %v1240_v1, %v1245_v16  ;;  %v1831_v8 = vpop.eup %1830 }
 0x65f   : > { %v1273_v25 = vsub.f32 0.0, %v1257_v21  ;;  %v1250_v27 = vsel %vm1248_vm5, %v1249_v19, %v1247_v23  ;;  %v1833_v29 = vpop.eup %1832  ;;  %v1266_v30 = vmul.f32 %v1831_v8, %v1243_v6 }
 0x660   : > { %v1272_v7 = vsub.f32 0.0, %v1250_v27  ;;  %v1259_v32 = vmul.f32 %v1833_v29, %v1242_v3 }
 0x661   : > { %1277 = vst [vmem:[%s197_s28 + $0x8] sm:$0xff] %v1273_v25  ;;  %v1268_v12 = vsel %vm1267_vm6, %v1243_v6, %v1266_v30 }
 0x662   : > { %1276 = vst [vmem:[%s197_s28] sm:$0xff] %v1272_v7  ;;  %v1271_v34 = vsel %vm1269_vm7, %v1270_v31, %v1268_v12  ;;  %v1261_v10 = vsel %vm1260_vm8, %v1242_v3, %v1259_v32 }
 0x663   : > { %v1275_v35 = vsub.f32 0.0, %v1271_v34  ;;  %v1264_v36 = vsel %vm1262_vm9, %v1263_v33, %v1261_v10 }
 0x664   : > { %v1274_v41 = vsub.f32 0.0, %v1264_v36 }
 0x665   : > { %1279 = vst [vmem:[%s197_s28 + $0x18] sm:$0xff] %v1275_v35 }
 0x666   : > { %1278 = vst [vmem:[%s197_s28 + $0x10] sm:$0xff] %v1274_v41 }
 0x667 PF: > { %s14_s15 = sadd.s32 1, %s1840_s15  }
 0x668   : > { %p11_p4 = scmp.ge.s32.totalorder %s14_s15, 6  }
 0x66a   :  { %13 = sbr.rel (!%p11_p4) target bundleno = 1 (0x1), region = 70 }

</bundles_post_ra>
